<compile_context>
chip_gen: v6e
topology: v6e:2x2x1
jax: 0.10.0
libtpu: 0.0.40
codegen_flags: <defaults>
</compile_context>

<pallas_src>
import functools

import jax
import jax.numpy as jnp
from jax.experimental import pallas as pl
from jax.experimental.pallas import tpu as pltpu


def _time_encoder_kernel(t_ref, q_ref, m_ref,
                         wsel_ref, bsel_ref, ww_ref, bw_ref,
                         o_ref, *, inv_sqrt_d1):
    # Block shapes:
    #   t_ref: (TB, S, 1)   q_ref: (TB, S, d1)   m_ref: (TB, S)
    #   wsel_ref: (1, d0)   bsel_ref: (1, d0)
    #   ww_ref:   (d0, d1)  bw_ref:   (1, d1)
    #   o_ref:    (TB, S)
    t = t_ref[...]            # (TB, S, 1)
    q = q_ref[...]            # (TB, S, d1)
    m = m_ref[...]            # (TB, S) float, >0 => masked

    wsel = wsel_ref[...]      # (1, d0)  == selection_layer.weight.T
    bsel = bsel_ref[...]      # (1, d0)
    ww = ww_ref[...]          # (d0, d1) == weight_layer.weight.T
    bw = bw_ref[...]          # (1, d1)

    tb, s, _ = t.shape
    d0, d1 = ww.shape

    # Linear(1 -> d0): per-(b,s) scalar times weight row — VPU broadcast.
    h = t * wsel + bsel                          # (TB, S, d0)
    f = 1.0 - jnp.tanh(h * h)                    # (TB, S, d0)

    # Linear(d0 -> d1): single MXU matmul over all TB*S rows, then ReLU.
    f2 = f.reshape(tb * s, d0)                   # leading-dim collapse
    g2 = jnp.dot(f2, ww, preferred_element_type=jnp.float32) + bw
    g = jnp.maximum(g2, 0.0).reshape(tb, s, d1)  # (TB, S, d1)

    # Scaled dot with the query, reduce feature (lane) axis -> (TB, S).
    score = jnp.sum(g * q, axis=-1) * inv_sqrt_d1

    # masked_fill_(mask, -inf), softmax over the sequence (lane) axis.
    score = jnp.where(m > 0.0, -jnp.inf, score)
    mx = jnp.max(score, axis=-1, keepdims=True)
    e = jnp.exp(score - mx)
    o_ref[...] = e / jnp.sum(e, axis=-1, keepdims=True)


def _pick_batch_block(B, S, d1):
    """Pick TB so TB*S rows amortize per-step overhead, blocks stay legal
    ((TB, S) needs TB % 8 == 0 or TB == B), VMEM stays modest (v7x), and
    v7x megacore keeps >=2 grid steps when the batch allows it."""
    target_rows = 1024
    # Keep the double-buffered query block comfortably small on v7x VMEM.
    max_rows_by_vmem = max(8, (4 << 20) // max(d1 * 4, 1))
    target_rows = min(target_rows, max_rows_by_vmem)

    tb = max(1, target_rows // max(S, 1))
    if tb >= B:
        tb = B
        # Leave two parallel grid steps for v7x's dual TensorCores.
        if B >= 16 and (B // 2) % 8 == 0:
            tb = B // 2
        return tb
    if B <= 8:
        return B
    tb = max(8, (tb // 8) * 8)
    return min(tb, B)


def time_encoder_pallas(seq_time_step, final_queries, mask,
                        w_sel, b_sel, w_w, b_w, *, batch_block=None):
    """Pallas TimeEncoder forward.

    seq_time_step: (B, S, 1) f32
    final_queries: (B, S, d1) f32
    mask:          (B, S, 1) bool (True => masked with -inf)
    w_sel: (d0, 1), b_sel: (d0,)   -- selection_layer (torch Linear layout)
    w_w:   (d1, d0), b_w: (d1,)    -- weight_layer    (torch Linear layout)
    returns (B, S, 1) f32 softmax over axis 1.
    """
    B, S, _ = seq_time_step.shape
    d0 = w_sel.shape[0]
    d1 = w_w.shape[0]

    tb = batch_block if batch_block is not None else _pick_batch_block(B, S, d1)
    grid = (pl.cdiv(B, tb),)

    def f32(x):
        return x if x.dtype == jnp.float32 else x.astype(jnp.float32)

    t = f32(seq_time_step)                       # (B, S, 1) — no copy if f32
    q = f32(final_queries)                       # (B, S, d1) — no copy if f32
    # Mask squeezed/cast once: (B, S) f32 is negligible vs the query read.
    m = mask.reshape(B, S).astype(jnp.float32)

    wsel_t = f32(w_sel).T.reshape(1, d0)         # (1, d0)
    bsel = f32(b_sel).reshape(1, d0)
    ww_t = f32(w_w).T.reshape(d0, d1)            # (d0, d1)
    bw = f32(b_w).reshape(1, d1)

    kernel = functools.partial(_time_encoder_kernel,
                               inv_sqrt_d1=1.0 / (d1 ** 0.5))

    out = pl.pallas_call(
        kernel,
        out_shape=jax.ShapeDtypeStruct((B, S), jnp.float32),
        grid=grid,
        in_specs=[
            pl.BlockSpec((tb, S, 1), lambda b: (b, 0, 0)),   # seq_time_step
            pl.BlockSpec((tb, S, d1), lambda b: (b, 0, 0)),  # final_queries
            pl.BlockSpec((tb, S), lambda b: (b, 0)),         # mask (f32)
            pl.BlockSpec(memory_space=pltpu.MemorySpace.VMEM),  # Wsel^T
            pl.BlockSpec(memory_space=pltpu.MemorySpace.VMEM),  # bsel
            pl.BlockSpec(memory_space=pltpu.MemorySpace.VMEM),  # Ww^T
            pl.BlockSpec(memory_space=pltpu.MemorySpace.VMEM),  # bw
        ],
        out_specs=pl.BlockSpec((tb, S), lambda b: (b, 0)),
        compiler_params=pltpu.CompilerParams(
            dimension_semantics=("parallel",)),
    )(t, q, m, wsel_t, bsel, ww_t, bw)

    return out.reshape(B, S, 1)


def time_encoder_ref(seq_time_step, final_queries, mask, w_sel, b_sel, w_w, b_w):
    """Pure-JAX reference matching the PyTorch forward exactly."""
    d1 = w_w.shape[0]
    f = 1.0 - jnp.tanh(jnp.square(seq_time_step @ w_sel.T + b_sel))
    g = jax.nn.relu(f @ w_w.T + b_w)
    s = jnp.sum(g * final_queries, axis=2, keepdims=True) / (d1 ** 0.5)
    s = jnp.where(mask, -jnp.inf, s)
    return jax.nn.softmax(s, axis=1)


def _run_case(key, B, S, d0, d1):
    k_t, k_q, k_m, k_w1, k_b1, k_w2, k_b2 = jax.random.split(key, 7)

    seq_time_step = jax.random.uniform(k_t, (B, S, 1), jnp.float32) * 10.0
    final_queries = jax.random.normal(k_q, (B, S, d1), jnp.float32)
    # Keep at least one unmasked position per batch row (fully-masked rows
    # NaN in both the PyTorch reference and this kernel).
    mask = jax.random.uniform(k_m, (B, S, 1)) > 0.7
    mask = mask.at[:, 0, :].set(False)

    # "torch Linear"-shaped parameters.
    w_sel = jax.random.normal(k_w1, (d0, 1), jnp.float32) * 0.5
    b_sel = jax.random.normal(k_b1, (d0,), jnp.float32) * 0.1
    w_w = jax.random.normal(k_w2, (d1, d0), jnp.float32) * (1.0 / d0 ** 0.5)
    b_w = jax.random.normal(k_b2, (d1,), jnp.float32) * 0.1

    out = time_encoder_pallas(seq_time_step, final_queries, mask,
                              w_sel, b_sel, w_w, b_w)
    out = jax.block_until_ready(out)

    ref = time_encoder_ref(seq_time_step, final_queries, mask,
                           w_sel, b_sel, w_w, b_w)
    assert out.shape == (B, S, 1)
    assert jnp.allclose(out, ref, atol=1e-5, rtol=1e-5), "mismatch vs reference"


if __name__ == "__main__":
    key = jax.random.PRNGKey(0)
    k1, k2 = jax.random.split(key)

    # hita_time_selection_layer_global = [32, 32]
    _run_case(k1, B=2, S=8, d0=32, d1=32)     # single grid step (TB == B)
    _run_case(k2, B=16, S=8, d0=32, d1=32)    # multi-step path (TB = 8, grid 2)

    print("KERNEL_OK")
</pallas_src>

<mosaic_0001>
module attributes {stable_mosaic.version = 11 : i64} {
  func.func @_time_encoder_kernel(%arg0: i32, %arg1: memref<2x8x1xf32, #tpu.memory_space<vmem>>, %arg2: memref<2x8x32xf32, #tpu.memory_space<vmem>>, %arg3: memref<2x8xf32, #tpu.memory_space<vmem>>, %arg4: memref<1x32xf32, #tpu.memory_space<vmem>>, %arg5: memref<1x32xf32, #tpu.memory_space<vmem>>, %arg6: memref<32x32xf32, #tpu.memory_space<vmem>>, %arg7: memref<1x32xf32, #tpu.memory_space<vmem>>, %arg8: memref<2x8xf32, #tpu.memory_space<vmem>>) attributes {dimension_semantics = [#tpu.dimension_semantics<parallel>], iteration_bounds = array<i64: 1>, scalar_prefetch = 0 : i64, scratch_operands = 0 : i64, tpu.core_type = #tpu.core_type<tc>, window_params = [{transform_indices = @transform_0, window_bounds = array<i64: 2, 8, 1>}, {transform_indices = @transform_1, window_bounds = array<i64: 2, 8, 32>}, {transform_indices = @transform_2, window_bounds = array<i64: 2, 8>}, {pipeline_mode = #tpu.pipeline_mode<synchronous>, transform_indices = @transform_3, window_bounds = array<i64: 1, 32>}, {pipeline_mode = #tpu.pipeline_mode<synchronous>, transform_indices = @transform_4, window_bounds = array<i64: 1, 32>}, {pipeline_mode = #tpu.pipeline_mode<synchronous>, transform_indices = @transform_5, window_bounds = array<i64: 32, 32>}, {pipeline_mode = #tpu.pipeline_mode<synchronous>, transform_indices = @transform_6, window_bounds = array<i64: 1, 32>}, {transform_indices = @transform_7, window_bounds = array<i64: 2, 8>}]} {
    %c0 = arith.constant 0 : index
    %c0_0 = arith.constant 0 : index
    %c0_1 = arith.constant 0 : index
    %0 = vector.load %arg1[%c0, %c0_0, %c0_1] : memref<2x8x1xf32, #tpu.memory_space<vmem>>, vector<2x8x1xf32>
    %c0_2 = arith.constant 0 : index
    %c0_3 = arith.constant 0 : index
    %c0_4 = arith.constant 0 : index
    %1 = vector.load %arg2[%c0_2, %c0_3, %c0_4] : memref<2x8x32xf32, #tpu.memory_space<vmem>>, vector<2x8x32xf32>
    %c0_5 = arith.constant 0 : index
    %c0_6 = arith.constant 0 : index
    %2 = vector.load %arg3[%c0_5, %c0_6] : memref<2x8xf32, #tpu.memory_space<vmem>>, vector<2x8xf32>
    %c0_7 = arith.constant 0 : index
    %c0_8 = arith.constant 0 : index
    %3 = vector.load %arg4[%c0_7, %c0_8] : memref<1x32xf32, #tpu.memory_space<vmem>>, vector<1x32xf32>
    %c0_9 = arith.constant 0 : index
    %c0_10 = arith.constant 0 : index
    %4 = vector.load %arg5[%c0_9, %c0_10] : memref<1x32xf32, #tpu.memory_space<vmem>>, vector<1x32xf32>
    %c0_11 = arith.constant 0 : index
    %c0_12 = arith.constant 0 : index
    %5 = vector.load %arg6[%c0_11, %c0_12] : memref<32x32xf32, #tpu.memory_space<vmem>>, vector<32x32xf32>
    %c0_13 = arith.constant 0 : index
    %c0_14 = arith.constant 0 : index
    %6 = vector.load %arg7[%c0_13, %c0_14] : memref<1x32xf32, #tpu.memory_space<vmem>>, vector<1x32xf32>
    %7 = vector.shape_cast %3 : vector<1x32xf32> to vector<1x1x32xf32>
    %8 = vector.broadcast %0 : vector<2x8x1xf32> to vector<2x8x32xf32>
    %9 = vector.broadcast %7 : vector<1x1x32xf32> to vector<2x8x32xf32>
    %10 = arith.mulf %8, %9 : vector<2x8x32xf32>
    %11 = vector.shape_cast %4 : vector<1x32xf32> to vector<1x1x32xf32>
    %12 = vector.broadcast %11 : vector<1x1x32xf32> to vector<2x8x32xf32>
    %13 = arith.addf %10, %12 : vector<2x8x32xf32>
    %14 = arith.mulf %13, %13 : vector<2x8x32xf32>
    %15 = math.tanh %14 : vector<2x8x32xf32>
    %cst = arith.constant 1.000000e+00 : f32
    %16 = vector.broadcast %cst : f32 to vector<2x8x32xf32>
    %17 = arith.subf %16, %15 : vector<2x8x32xf32>
    %18 = vector.shape_cast %17 : vector<2x8x32xf32> to vector<16x32xf32>
    %cst_15 = arith.constant dense<0.000000e+00> : vector<16x32xf32>
    %19 = tpu.matmul %18, %5, %cst_15 {dimension_numbers = #tpu.dot_dimension_numbers<[1], [0], [0], [1], [0, 0, 1, 1], [], []>} : vector<16x32xf32>, vector<32x32xf32>, vector<16x32xf32> -> vector<16x32xf32>
    %20 = vector.broadcast %6 : vector<1x32xf32> to vector<16x32xf32>
    %21 = arith.addf %19, %20 : vector<16x32xf32>
    %cst_16 = arith.constant 0.000000e+00 : f32
    %22 = vector.broadcast %cst_16 : f32 to vector<16x32xf32>
    %23 = arith.maximumf %21, %22 : vector<16x32xf32>
    %24 = vector.shape_cast %23 : vector<16x32xf32> to vector<2x8x32xf32>
    %25 = arith.mulf %24, %1 : vector<2x8x32xf32>
    %cst_17 = arith.constant dense<0.000000e+00> : vector<2x8xf32>
    %26 = vector.multi_reduction <add>, %25, %cst_17 [2] : vector<2x8x32xf32> to vector<2x8xf32>
    %cst_18 = arith.constant 0.176776692 : f32
    %27 = vector.broadcast %cst_18 : f32 to vector<2x8xf32>
    %28 = arith.mulf %26, %27 : vector<2x8xf32>
    %cst_19 = arith.constant 0.000000e+00 : f32
    %29 = vector.broadcast %cst_19 : f32 to vector<2x8xf32>
    %30 = arith.cmpf ogt, %2, %29 : vector<2x8xf32>
    %cst_20 = arith.constant 0xFF800000 : f32
    %31 = vector.broadcast %cst_20 : f32 to vector<2x8xf32>
    %32 = arith.select %30, %31, %28 : vector<2x8xi1>, vector<2x8xf32>
    %cst_21 = arith.constant dense<0xFF800000> : vector<2xf32>
    %33 = vector.multi_reduction <maximumf>, %32, %cst_21 [1] : vector<2x8xf32> to vector<2xf32>
    %34 = vector.shape_cast %33 : vector<2xf32> to vector<2x1xf32>
    %35 = vector.broadcast %34 : vector<2x1xf32> to vector<2x8xf32>
    %36 = arith.subf %32, %35 : vector<2x8xf32>
    %37 = math.exp %36 : vector<2x8xf32>
    %cst_22 = arith.constant dense<0.000000e+00> : vector<2xf32>
    %38 = vector.multi_reduction <add>, %37, %cst_22 [1] : vector<2x8xf32> to vector<2xf32>
    %39 = vector.shape_cast %38 : vector<2xf32> to vector<2x1xf32>
    %40 = vector.broadcast %39 : vector<2x1xf32> to vector<2x8xf32>
    %41 = arith.divf %37, %40 : vector<2x8xf32>
    %c0_23 = arith.constant 0 : index
    %c0_24 = arith.constant 0 : index
    %42 = vector.load %arg8[%c0_23, %c0_24] : memref<2x8xf32, #tpu.memory_space<vmem>>, vector<2x8xf32>
    tpu.vector_store %arg8[%c0_23, %c0_24], %41 {strides = array<i32>} : memref<2x8xf32, #tpu.memory_space<vmem>>, vector<2x8xf32>,
    return
  }
  func.func @transform_0(%arg0: i32) -> (i32, i32, i32) {
    %c0_i32 = arith.constant 0 : i32
    %c0_i32_0 = arith.constant 0 : i32
    %c0_i32_1 = arith.constant 0 : i32
    return %arg0, %c0_i32, %c0_i32_0 : i32, i32, i32
  }
  func.func @transform_1(%arg0: i32) -> (i32, i32, i32) {
    %c0_i32 = arith.constant 0 : i32
    %c0_i32_0 = arith.constant 0 : i32
    %c0_i32_1 = arith.constant 0 : i32
    return %arg0, %c0_i32, %c0_i32_0 : i32, i32, i32
  }
  func.func @transform_2(%arg0: i32) -> (i32, i32) {
    %c0_i32 = arith.constant 0 : i32
    %c0_i32_0 = arith.constant 0 : i32
    return %arg0, %c0_i32 : i32, i32
  }
  func.func @transform_3(%arg0: i32) -> (i32, i32) {
    %c0_i32 = arith.constant 0 : i32
    %c0_i32_0 = arith.constant 0 : i32
    %c0_i32_1 = arith.constant 0 : i32
    return %c0_i32, %c0_i32_0 : i32, i32
  }
  func.func @transform_4(%arg0: i32) -> (i32, i32) {
    %c0_i32 = arith.constant 0 : i32
    %c0_i32_0 = arith.constant 0 : i32
    %c0_i32_1 = arith.constant 0 : i32
    return %c0_i32, %c0_i32_0 : i32, i32
  }
  func.func @transform_5(%arg0: i32) -> (i32, i32) {
    %c0_i32 = arith.constant 0 : i32
    %c0_i32_0 = arith.constant 0 : i32
    %c0_i32_1 = arith.constant 0 : i32
    return %c0_i32, %c0_i32_0 : i32, i32
  }
  func.func @transform_6(%arg0: i32) -> (i32, i32) {
    %c0_i32 = arith.constant 0 : i32
    %c0_i32_0 = arith.constant 0 : i32
    %c0_i32_1 = arith.constant 0 : i32
    return %c0_i32, %c0_i32_0 : i32, i32
  }
  func.func @transform_7(%arg0: i32) -> (i32, i32) {
    %c0_i32 = arith.constant 0 : i32
    %c0_i32_0 = arith.constant 0 : i32
    return %arg0, %c0_i32 : i32, i32
  }
}

</mosaic_0001>

<bundles_post_ra>
// kernel: tpu_custom_call.1
= control target key start
LH: loop header
LB: loop body
LE: loop exit
PB: predicated region body
PF: predicated region fallthrough
CT: control target
= control target key end

     0   :  { %12 = vsyncpa [#allocation3], 0  ;;  %s392_s0 = inlined_call_operand.vmem [shape: f32[2,8,1], index: 0, kind: input, shape index: {}]   ;;  %s393_s1 = inlined_call_operand.vmem [shape: f32[2,8,32], index: 1, kind: input, shape index: {}]   ;;  %s394_s2 = inlined_call_operand.vmem [shape: f32[2,8], index: 2, kind: input, shape index: {}]   ;;  %s395_s3 = inlined_call_operand.vmem [shape: f32[1,32], index: 3, kind: input, shape index: {}]   ;;  %s396_s4 = inlined_call_operand.vmem [shape: f32[1,32], index: 4, kind: input, shape index: {}]   ;;  %s397_s5 = inlined_call_operand.hbm [shape: f32[32,32], index: 5, kind: input, shape index: {}]   ;;  %s398_s6 = inlined_call_operand.vmem [shape: f32[1,32], index: 6, kind: input, shape index: {}]   ;;  %s399_s7 = inlined_call_operand.hbm [shape: f32[2,8], index: 7, kind: output, shape index: {}]  }
   0x1   :  { %13 = vsyncpa [#allocation4], 0  ;;  %s310_s24 = smov [#allocation2]  }
   0x2   :  { %s29_s25 = sshll.u32 %s310_s24, 4  ;;  %s30_s25 = int_to_ptr.vmem [resolvable:$true] %s29_s25 }
   0x3   :  { %s274_s26 = scalar_lea.vmem %s30_s25, 512  ;;  %p279_p1 = scmp.lt.s32.totalorder %s30_s25, %s30_s25 }
   0x4   :  { %p275_p0 = scmp.ne.s32.totalorder %s30_s25, %s274_s26  ;;  %p280_p2 = scmp.lt.s32.totalorder %s274_s26, %s274_s26 }
   0x6   :  { %p281_p3 = por %p280_p2, %p279_p1 }
   0x8   :  { %p282_p4 = pnand %p281_p3, %p275_p0 }
   0xa   :  { %285 = shalt.err (!%p282_p4)
}
   0xb   :  { %s311_s27 = smov 128   ;;  %s312_s28 = smov 8  }
   0xc   :  { %35 = dma.hbm_to_vmem [thread:$0]  %s397_s5, 512, %s30_s25, [#allocation3], %s311_s27, %s311_s27, %s312_s28  }
   0xd   :  { %306 = dma.done.wait [#allocation3], 512  }
   0xe   :  { %307 = vsyncadd [#allocation3], 4294966784  ;;  %v313_v0 = vmov 0   ;;  %v41_v1 = vld [vmem:[%s392_s0] sm:$0xff]  ;;  %v42_v2 = vld [vmem:[%s392_s0 + $0x8] sm:$0xff]  ;;  %vm91_vm0 = vcmask 261120   ;;  %v188_v34 = vlaneseq }
   0xf   :  { %257 = vset.pattern.permute.xlu0 %v313_v0  ;;  %v51_v3 = vld [vmem:[#allocation2 + $0x18] sm:$0xff]  ;;  %v50_v4 = vld [vmem:[#allocation2 + $0x10] sm:$0xff]  ;;  %v49_v5 = vld [vmem:[#allocation2 + $0x8] sm:$0xff]  ;;  %vm198_vm1 = vcmask 1041409   ;;  %vm202_vm3 = vcmask 58368  }
  0x10   :  { %55 = vperm.xlu0 %257, %v41_v1   ;;  %241 = vmatprep.subr.mxu0 %v51_v3  ;;  %v48_v6 = vld [vmem:[#allocation2] sm:$0xff]  ;;  %v44_v29 = vld [vmem:[%s393_s1 + $0x8] sm:$0xff]  ;;  %v189_v35 = vand.u32 127, %v188_v34  ;;  %v191_v36 = vshrl.u32 %v188_v34, 7 }
  0x11   :  { %242 = vmatpush3.msra.mxu0 %v51_v3  ;;  %v230_v7 = vld [vmem:[%s395_s3] ss:$0 sm:$0xff] }
  0x12   :  { %243 = vmatprep.subr.mxu0 %v50_v4  ;;  %v231_v8 = vld [vmem:[%s396_s4] ss:$0 sm:$0xff]  ;;  %v192_v38 = vsub.s32 %v189_v35, %v191_v36 }
  0x13   :  { %244 = vmatpush3.msra.mxu0 %v50_v4  ;;  %v232_v21 = vld [vmem:[%s398_s6] ss:$0 sm:$0xff] }
  0x14   :  { %60 = vperm.xlu0 %257, %v42_v2   ;;  %245 = vmatprep.subr.mxu0 %v49_v5  ;;  %v43_v26 = vld [vmem:[%s393_s1] sm:$0xff]  ;;  %s314_s1 = smov [#allocation5]  }
  0x15   :  { %246 = vmatpush3.msra.mxu0 %v49_v5  ;;  %v45_v41 = vld [vmem:[%s394_s2] sm:$0x3]  ;;  %s221_s2 = sshll.u32 %s314_s1, 4  ;;  %s222_s2 = int_to_ptr.vmem [resolvable:$true] %s221_s2 }
  0x16   :  { %247 = vmatprep.subr.mxu0 %v48_v6  ;;  %vm185_vm2 = vcmp.gt.f32.partialorder %v45_v41, 0.0  ;;  %s286_s19 = scalar_lea.vmem %s222_s2, 32  ;;  %p291_p6 = scmp.lt.s32.totalorder %s222_s2, %s222_s2 }
  0x17   :  { %248 = vmatpush3.msra.mxu0 %v48_v6  ;;  %p287_p5 = scmp.ne.s32.totalorder %s222_s2, %s286_s19  ;;  %p292_p7 = scmp.lt.s32.totalorder %s286_s19, %s286_s19 }
  0x19   :  { %p293_p8 = por %p292_p7, %p291_p6 }
  0x1b   :  { %p294_p9 = pnand %p293_p8, %p287_p5 }
  0x8b   :  { %v56_v9 = vpop.permute.xlu0 %55 }
  0x8c   :  { %v69_v10 = vmul.f32 %v230_v7, %v56_v9 }
  0x8e   :  { %v77_v11 = vadd.f32 %v231_v8, %v69_v10 }
  0x8f   :  { %v61_v12 = vpop.permute.xlu0 %60 }
  0x90   :  { %v79_v13 = vmul.f32 %v77_v11, %v77_v11  ;;  %v70_v14 = vmul.f32 %v230_v7, %v61_v12 }
  0x92   :  { %258 = vtanh.f32 %v79_v13  ;;  %v78_v15 = vadd.f32 %v231_v8, %v70_v14 }
  0x94   :  { %v80_v16 = vmul.f32 %v78_v15, %v78_v15 }
  0x96   :  { %260 = vtanh.f32 %v80_v16 }
  0x9f   :  { %v259_v17 = vpop.eup %258 }
  0xa0   :  { %v83_v18 = vsub.f32 1.0, %v259_v17 }
  0xa2   :  { %249 = vmatprep.mubr.msk.f32.mxu0 %vm91_vm0, %v83_v18 }
  0xa3   :  { %v261_v19 = vpop.eup %260 }
  0xa4   :  { %v84_v20 = vsub.f32 1.0, %v261_v19 }
  0xa6   :  { %250 = vmatmul.mubr.msk.f32.vlgmr.msra.gmra.mxu0 %vm91_vm0, %v84_v20 }
 0x166   :  { %v251_v22 = vpop.f32.mrf.mxu0 }
 0x167   :  { %v170_v23 = vadd.f32 %v251_v22, %v232_v21 }
 0x168   :  { %v164_v24 = vpop.f32.mrf.mxu0 }
 0x169   :  { %v165_v25 = vadd.f32 %v232_v21, %v164_v24  ;;  %v174_v27 = vmax.f32 %v170_v23, 0.0 }
 0x16b   :  { %v173_v28 = vmax.f32 %v165_v25, 0.0  ;;  %v176_v32 = vmul.f32 %v174_v27, %v44_v29 }
 0x16d   :  { %v175_v30 = vmul.f32 %v173_v28, %v43_v26  ;;  %v180_v33 = vsel %vm91_vm0, %v176_v32, 0.0 }
 0x16f   :  { %v177_v31 = vsel %vm91_vm0, %v175_v30, 0.0 }
 0x170   :  { %178 = vadd.xlane.f32.xlu1 %v177_v31 }
 0x174   :  { %181 = vadd.xlane.f32.xlu1 %v180_v33 }
 0x1f9   :  { %v179_v37 = vpop.xlane.xlu1 %178 }
 0x1fa   :  { %v183_v39 = vmul.f32 0.17677669, %v179_v37 }
 0x1fc   :  { %v193_v43 = vrot.slane %v183_v39, %v192_v38 }
 0x1fd   :  { %v182_v40 = vpop.xlane.xlu1 %181 }
 0x1fe   :  { %v184_v42 = vmul.f32 0.17677669, %v182_v40 }
 0x200   :  { %v197_v44 = vrot.slane %v184_v42, %v192_v38 }
 0x202   :  { %v199_v45 = vsel %vm198_vm1, %v197_v44, %v193_v43 }
 0x203   :  { %v201_v46 = vsel %vm185_vm2, -inf, %v199_v45 }
 0x204   :  { %v203_v47 = vsel %vm202_vm3, %v201_v46, -inf }
 0x205   :  { %204 = vmax.xlane.f32.xlu0 %v203_v47 }
 0x28e   :  { %v205_v48 = vpop.xlane.xlu0 %204 }
 0x28f   :  { %v206_v49 = vsub.f32 %v201_v46, %v205_v48 }
 0x291   :  { %v207_v50 = vmul.f32 1.442695, %v206_v49 }
 0x293   :  { %262 = vpow2.f32 %v207_v50 }
 0x2a0   :  { %v263_v51 = vpop.eup %262 }
 0x2a1   :  { %v209_v52 = vsel %vm202_vm3, %v263_v51, 0.0 }
 0x2a2   :  { %210 = vadd.xlane.f32.xlu1 %v209_v52 }
 0x32b   :  { %v211_v53 = vpop.xlane.xlu1 %210 }
 0x32c   :  { %264 = vrcp.f32 %v211_v53 }
 0x339   :  { %v265_v54 = vpop.eup %264 }
 0x33a   :  { %v213_v55 = vmul.f32 %v265_v54, %v263_v51 }
 0x33c   :  { %214 = vst.msk [vmem:[#allocation5] sm:$0x3] %vm202_vm3, %v213_v55 }
 0x33d   :  { %297 = shalt.err (!%p294_p9)
}
 0x33e   :  { %224 = dma.vmem_to_hbm [thread:$0]  %s222_s2, 32, %s399_s7, [#allocation4]  }
 0x33f   :  { %308 = dma.done.wait [#allocation4], 32  }
 0x340   :  { %309 = vsyncadd [#allocation4], 4294967264 }
 0x341   :  { %228 = vsyncpa [#allocation3], 1 }
 0x342   :  { %229 = vsyncpa [#allocation4], 1 }

</bundles_post_ra>
